<compile_context>
chip_gen: v7x
topology: tpu7x:2x2x1
jax: 0.10.0
libtpu: 0.0.40
codegen_flags: <defaults>
</compile_context>

<pallas_src>
import jax
import jax.numpy as jnp
from jax.experimental import pallas as pl
from jax.experimental.pallas import tpu as pltpu


def _fused_kernel(x_ref, p_ref, out_ref):
    # x_ref  : (3, 3) f32 -- one problem, original (C, S) layout
    # p_ref  : (8, 6) f32 -- packed params: [0:3,0:3]=W1, [0:3,3]=b1,
    #                                        [3:6,0:2]=W2^T, [6,0:2]=b2
    # out_ref: (3, 6) f32 -- flat output; out[i, 2*j+k] = relu(v2[i,j]) + lin2[j,k]
    x = x_ref[...]                     # (3, 3)  [c, s]
    params = p_ref[...]                # (8, 6)  single tiny VMEM load
    w1 = params[0:3, 0:3]              # (3, 3)  [j, c]   (W1 as-is)
    b1c = params[0:3, 3:4]             # (3, 1)  b1 as a column
    w2t = params[3:6, 0:2]             # (3, 2)  [m, k]   (W2^T)
    b2r = params[6:7, 0:2]             # (1, 2)

    # Linear(3, 3) on the VPU, contracting the channel axis of x directly:
    #   v2t[j, s] = b1[j] + sum_c W1[j, c] * x[c, s]
    v2t = (b1c
           + w1[:, 0:1] * x[0:1, :]
           + w1[:, 1:2] * x[1:2, :]
           + w1[:, 2:3] * x[2:3, :])          # (3, 3)  [j, s]

    v2 = v2t.T                                 # (3, 3)  [s, j]  (one tiny XLU transpose)

    # Linear(3, 2) on the VPU:
    #   lin2[s, k] = b2[k] + sum_m v2[s, m] * W2[k, m]
    lin2 = (b2r
            + v2[:, 0:1] * w2t[0:1, :]
            + v2[:, 1:2] * w2t[1:2, :]
            + v2[:, 2:3] * w2t[2:3, :])        # (3, 2)  [j, k]

    r = jnp.maximum(v2, 0.0)                   # (3, 3)  relu(v2), [i, j]

    # Single lane-dense store of the flat (3, 6) block:
    #   out[i, 2*j + k] = r[i, j] + lin2[j, k]
    out_ref[...] = jnp.concatenate(
        [r[:, j:j + 1] + lin2[j:j + 1, :] for j in range(3)], axis=1)


def pack_params(w1, b1, w2, b2):
    """Pack all Linear parameters into one small VMEM slab (done once)."""
    p = jnp.zeros((8, 6), jnp.float32)
    p = p.at[0:3, 0:3].set(w1.astype(jnp.float32))
    p = p.at[0:3, 3].set(b1.astype(jnp.float32))
    p = p.at[3:6, 0:2].set(w2.T.astype(jnp.float32))
    p = p.at[6, 0:2].set(b2.astype(jnp.float32))
    return p


def _run(x_n, packed_params):
    """x_n: (N, 3, 3) f32 -- N independent problems.  Returns (N, 3, 6) f32."""
    n = x_n.shape[0]
    return pl.pallas_call(
        _fused_kernel,
        out_shape=jax.ShapeDtypeStruct((n, 3, 6), jnp.float32),
        grid=(n,),
        in_specs=[
            # one (3, 3) problem per grid step (leading dim squeezed away)
            pl.BlockSpec((None, 3, 3), lambda i: (i, 0, 0)),
            # constant index_map: params DMA'd once, VMEM-resident across steps
            pl.BlockSpec((8, 6), lambda i: (0, 0)),
        ],
        out_specs=pl.BlockSpec((None, 3, 6), lambda i: (i, 0, 0)),
        compiler_params=pltpu.CompilerParams(
            dimension_semantics=("parallel",)),   # shards across both v7x TCs
    )(x_n, packed_params)


@jax.jit
def model_forward(x, packed_params):
    """x: (B=1, 3, S=3) float32.  Returns (S, 3, 2) float32, matching PyTorch."""
    B, C, S = x.shape
    assert B == 1 and C == 3 and S == 3, \
        "broadcast in the reference model requires B=1, S=3"
    out_flat = _run(x.reshape(1, C, S), packed_params)   # (1, 3, 6)
    return out_flat[0].reshape(S, C, 2)                  # free trailing-dim split


@jax.jit
def model_forward_many(xb, packed_params):
    """Amortized path: xb (N, 1, 3, 3) = N independent module invocations.

    Returns (N, 3, 3, 2).  Single pallas_call, N grid steps marked "parallel".
    """
    N = xb.shape[0]
    out_flat = _run(xb.reshape(N, 3, 3), packed_params)  # (N, 3, 6)
    return out_flat.reshape(N, 3, 3, 2)


def _reference(x, w1, b1, w2, b2):
    v1 = jnp.transpose(x, (0, 2, 1))
    v2 = v1 @ w1.T + b1
    x3 = jnp.transpose(v2, (1, 2, 0))
    return jnp.maximum(x3, 0.0) + (v2 @ w2.T + b2)


if __name__ == "__main__":
    key = jax.random.PRNGKey(0)
    k_x, k_w1, k_b1, k_w2, k_b2, k_xb = jax.random.split(key, 6)

    # deterministic "parameters" (Linear(3,3) and Linear(3,2) shapes)
    w1 = jax.random.uniform(k_w1, (3, 3), jnp.float32, -0.5, 0.5)
    b1 = jax.random.uniform(k_b1, (3,), jnp.float32, -0.5, 0.5)
    w2 = jax.random.uniform(k_w2, (2, 3), jnp.float32, -0.5, 0.5)
    b2 = jax.random.uniform(k_b2, (2,), jnp.float32, -0.5, 0.5)

    packed = pack_params(w1, b1, w2, b2)   # one-time parameter packing

    # --- single-shot path (matches the PyTorch module exactly) ---
    x = jax.random.normal(k_x, (1, 3, 3), jnp.float32)   # (B=1, C=3, S=3)
    out = jax.block_until_ready(model_forward(x, packed))
    ref = _reference(x, w1, b1, w2, b2)
    assert out.shape == (3, 3, 2), out.shape
    assert jnp.allclose(out, ref, atol=1e-5, rtol=1e-5), "single-shot mismatch"

    # --- amortized path: several independent invocations in one pallas_call ---
    xb = jax.random.normal(k_xb, (4, 1, 3, 3), jnp.float32)
    outb = jax.block_until_ready(model_forward_many(xb, packed))
    refb = jax.vmap(lambda xi: _reference(xi, w1, b1, w2, b2))(xb)
    assert outb.shape == (4, 3, 3, 2), outb.shape
    assert jnp.allclose(outb, refb, atol=1e-5, rtol=1e-5), "batched mismatch"

    print("KERNEL_OK")
</pallas_src>

<mosaic_0001>
module attributes {stable_mosaic.version = 11 : i64} {
  func.func @_fused_kernel(%arg0: i32, %arg1: memref<1x3x3xf32, #tpu.memory_space<vmem>>, %arg2: memref<8x6xf32, #tpu.memory_space<vmem>>, %arg3: memref<1x3x6xf32, #tpu.memory_space<vmem>>) attributes {dimension_semantics = [#tpu.dimension_semantics<parallel>], iteration_bounds = array<i64: 1>, scalar_prefetch = 0 : i64, scratch_operands = 0 : i64, tpu.core_type = #tpu.core_type<tc>, window_params = [{transform_indices = @transform_0, window_bounds = array<i64: 1, 3, 3>}, {pipeline_mode = #tpu.pipeline_mode<synchronous>, transform_indices = @transform_1, window_bounds = array<i64: 8, 6>}, {transform_indices = @transform_2, window_bounds = array<i64: 1, 3, 6>}]} {
    %c0 = arith.constant 0 : index
    %c0_0 = arith.constant 0 : index
    %c0_1 = arith.constant 0 : index
    %0 = vector.load %arg1[%c0, %c0_0, %c0_1] : memref<1x3x3xf32, #tpu.memory_space<vmem>>, vector<1x3x3xf32>
    %1 = vector.shape_cast %0 : vector<1x3x3xf32> to vector<3x3xf32>
    %c0_2 = arith.constant 0 : index
    %c0_3 = arith.constant 0 : index
    %2 = vector.load %arg2[%c0_2, %c0_3] : memref<8x6xf32, #tpu.memory_space<vmem>>, vector<8x6xf32>
    %3 = vector.extract_strided_slice %2 {offsets = [0, 0], sizes = [3, 3], strides = [1, 1]} : vector<8x6xf32> to vector<3x3xf32>
    %4 = vector.extract_strided_slice %2 {offsets = [0, 3], sizes = [3, 1], strides = [1, 1]} : vector<8x6xf32> to vector<3x1xf32>
    %5 = vector.extract_strided_slice %2 {offsets = [3, 0], sizes = [3, 2], strides = [1, 1]} : vector<8x6xf32> to vector<3x2xf32>
    %6 = vector.extract_strided_slice %2 {offsets = [6, 0], sizes = [1, 2], strides = [1, 1]} : vector<8x6xf32> to vector<1x2xf32>
    %7 = vector.extract_strided_slice %3 {offsets = [0, 0], sizes = [3, 1], strides = [1, 1]} : vector<3x3xf32> to vector<3x1xf32>
    %8 = vector.extract_strided_slice %1 {offsets = [0, 0], sizes = [1, 3], strides = [1, 1]} : vector<3x3xf32> to vector<1x3xf32>
    %9 = vector.broadcast %7 : vector<3x1xf32> to vector<3x3xf32>
    %10 = vector.broadcast %8 : vector<1x3xf32> to vector<3x3xf32>
    %11 = arith.mulf %9, %10 : vector<3x3xf32>
    %12 = vector.broadcast %4 : vector<3x1xf32> to vector<3x3xf32>
    %13 = arith.addf %12, %11 : vector<3x3xf32>
    %14 = vector.extract_strided_slice %3 {offsets = [0, 1], sizes = [3, 1], strides = [1, 1]} : vector<3x3xf32> to vector<3x1xf32>
    %15 = vector.extract_strided_slice %1 {offsets = [1, 0], sizes = [1, 3], strides = [1, 1]} : vector<3x3xf32> to vector<1x3xf32>
    %16 = vector.broadcast %14 : vector<3x1xf32> to vector<3x3xf32>
    %17 = vector.broadcast %15 : vector<1x3xf32> to vector<3x3xf32>
    %18 = arith.mulf %16, %17 : vector<3x3xf32>
    %19 = arith.addf %13, %18 : vector<3x3xf32>
    %20 = vector.extract_strided_slice %3 {offsets = [0, 2], sizes = [3, 1], strides = [1, 1]} : vector<3x3xf32> to vector<3x1xf32>
    %21 = vector.extract_strided_slice %1 {offsets = [2, 0], sizes = [1, 3], strides = [1, 1]} : vector<3x3xf32> to vector<1x3xf32>
    %22 = vector.broadcast %20 : vector<3x1xf32> to vector<3x3xf32>
    %23 = vector.broadcast %21 : vector<1x3xf32> to vector<3x3xf32>
    %24 = arith.mulf %22, %23 : vector<3x3xf32>
    %25 = arith.addf %19, %24 : vector<3x3xf32>
    %26 = tpu.transpose %25, [1, 0] : vector<3x3xf32> -> vector<3x3xf32>
    %27 = vector.extract_strided_slice %26 {offsets = [0, 0], sizes = [3, 1], strides = [1, 1]} : vector<3x3xf32> to vector<3x1xf32>
    %28 = vector.extract_strided_slice %5 {offsets = [0, 0], sizes = [1, 2], strides = [1, 1]} : vector<3x2xf32> to vector<1x2xf32>
    %29 = vector.broadcast %27 : vector<3x1xf32> to vector<3x2xf32>
    %30 = vector.broadcast %28 : vector<1x2xf32> to vector<3x2xf32>
    %31 = arith.mulf %29, %30 : vector<3x2xf32>
    %32 = vector.broadcast %6 : vector<1x2xf32> to vector<3x2xf32>
    %33 = arith.addf %32, %31 : vector<3x2xf32>
    %34 = vector.extract_strided_slice %26 {offsets = [0, 1], sizes = [3, 1], strides = [1, 1]} : vector<3x3xf32> to vector<3x1xf32>
    %35 = vector.extract_strided_slice %5 {offsets = [1, 0], sizes = [1, 2], strides = [1, 1]} : vector<3x2xf32> to vector<1x2xf32>
    %36 = vector.broadcast %34 : vector<3x1xf32> to vector<3x2xf32>
    %37 = vector.broadcast %35 : vector<1x2xf32> to vector<3x2xf32>
    %38 = arith.mulf %36, %37 : vector<3x2xf32>
    %39 = arith.addf %33, %38 : vector<3x2xf32>
    %40 = vector.extract_strided_slice %26 {offsets = [0, 2], sizes = [3, 1], strides = [1, 1]} : vector<3x3xf32> to vector<3x1xf32>
    %41 = vector.extract_strided_slice %5 {offsets = [2, 0], sizes = [1, 2], strides = [1, 1]} : vector<3x2xf32> to vector<1x2xf32>
    %42 = vector.broadcast %40 : vector<3x1xf32> to vector<3x2xf32>
    %43 = vector.broadcast %41 : vector<1x2xf32> to vector<3x2xf32>
    %44 = arith.mulf %42, %43 : vector<3x2xf32>
    %45 = arith.addf %39, %44 : vector<3x2xf32>
    %cst = arith.constant 0.000000e+00 : f32
    %46 = vector.broadcast %cst : f32 to vector<3x3xf32>
    %47 = arith.maximumf %26, %46 : vector<3x3xf32>
    %48 = vector.extract_strided_slice %47 {offsets = [0, 0], sizes = [3, 1], strides = [1, 1]} : vector<3x3xf32> to vector<3x1xf32>
    %49 = vector.extract_strided_slice %45 {offsets = [0, 0], sizes = [1, 2], strides = [1, 1]} : vector<3x2xf32> to vector<1x2xf32>
    %50 = vector.broadcast %48 : vector<3x1xf32> to vector<3x2xf32>
    %51 = vector.broadcast %49 : vector<1x2xf32> to vector<3x2xf32>
    %52 = arith.addf %50, %51 : vector<3x2xf32>
    %53 = vector.extract_strided_slice %47 {offsets = [0, 1], sizes = [3, 1], strides = [1, 1]} : vector<3x3xf32> to vector<3x1xf32>
    %54 = vector.extract_strided_slice %45 {offsets = [1, 0], sizes = [1, 2], strides = [1, 1]} : vector<3x2xf32> to vector<1x2xf32>
    %55 = vector.broadcast %53 : vector<3x1xf32> to vector<3x2xf32>
    %56 = vector.broadcast %54 : vector<1x2xf32> to vector<3x2xf32>
    %57 = arith.addf %55, %56 : vector<3x2xf32>
    %58 = vector.extract_strided_slice %47 {offsets = [0, 2], sizes = [3, 1], strides = [1, 1]} : vector<3x3xf32> to vector<3x1xf32>
    %59 = vector.extract_strided_slice %45 {offsets = [2, 0], sizes = [1, 2], strides = [1, 1]} : vector<3x2xf32> to vector<1x2xf32>
    %60 = vector.broadcast %58 : vector<3x1xf32> to vector<3x2xf32>
    %61 = vector.broadcast %59 : vector<1x2xf32> to vector<3x2xf32>
    %62 = arith.addf %60, %61 : vector<3x2xf32>
    %63 = tpu.concatenate %52, %57, %62 in 1 : vector<3x2xf32>, vector<3x2xf32>, vector<3x2xf32> -> vector<3x6xf32>
    %c0_4 = arith.constant 0 : index
    %c0_5 = arith.constant 0 : index
    %c0_6 = arith.constant 0 : index
    %64 = vector.load %arg3[%c0_4, %c0_5, %c0_6] : memref<1x3x6xf32, #tpu.memory_space<vmem>>, vector<1x3x6xf32>
    %65 = vector.shape_cast %64 : vector<1x3x6xf32> to vector<3x6xf32>
    %66 = vector.shape_cast %63 : vector<3x6xf32> to vector<1x3x6xf32>
    tpu.vector_store %arg3[%c0_4, %c0_5, %c0_6], %66 {strides = array<i32>} : memref<1x3x6xf32, #tpu.memory_space<vmem>>, vector<1x3x6xf32>,
    return
  }
  func.func @transform_0(%arg0: i32) -> (i32, i32, i32) {
    %c0_i32 = arith.constant 0 : i32
    %c0_i32_0 = arith.constant 0 : i32
    %c0_i32_1 = arith.constant 0 : i32
    return %arg0, %c0_i32, %c0_i32_0 : i32, i32, i32
  }
  func.func @transform_1(%arg0: i32) -> (i32, i32) {
    %c0_i32 = arith.constant 0 : i32
    %c0_i32_0 = arith.constant 0 : i32
    %c0_i32_1 = arith.constant 0 : i32
    return %c0_i32, %c0_i32_0 : i32, i32
  }
  func.func @transform_2(%arg0: i32) -> (i32, i32, i32) {
    %c0_i32 = arith.constant 0 : i32
    %c0_i32_0 = arith.constant 0 : i32
    %c0_i32_1 = arith.constant 0 : i32
    return %arg0, %c0_i32, %c0_i32_0 : i32, i32, i32
  }
}

</mosaic_0001>

<bundles_post_ra>
// kernel: model_forward.1
= control target key start
LH: loop header
LB: loop body
LE: loop exit
PB: predicated region body
PF: predicated region fallthrough
CT: control target
= control target key end

     0   :  { %v179_v0 = vmov 0   ;;  %v180_v2 = vmov 1   ;;  %v181_v3 = vmov 3   ;;  %v182_v4 = vmov 2   ;;  %s209_s1 = inlined_call_operand.vmem [shape: f32[8,6], index: 1, kind: input, shape index: {}]   ;;  %s210_s0 = inlined_call_operand.vmem [shape: f32[1,3,3], index: 0, kind: input, shape index: {}]   ;;  %s211_s2 = inlined_call_operand.vmem [shape: f32[1,3,6], index: 2, kind: output, shape index: {}]  }
   0x1   :  { %169 = vset.pattern.permute.xlu0 %v179_v0  ;;  %v12_v1 = vld [vmem:[%s209_s1] sm:$0xff]  ;;  %171 = vset.pattern.permute.xlu1 %v180_v2  ;;  %v18_v5 = vlaneseq  ;;  %s184_s1 = smov 4   ;;  %vm152_vm0 = vcmask 15360   ;;  %vm154_vm1 = vcmask 31744   ;;  %vm156_vm2 = vcmask 43008  }
   0x2   :  { %15 = vperm.xlu0 %169, %v12_v1   ;;  %29 = vperm.xlu1 %171, %v12_v1   ;;  %v11_v8 = vld [vmem:[%s210_s0] sm:$0x7]  ;;  %s183_s0 = smov 2  }
   0x3   :  { %v19_v6 = vshrl.u32 %v18_v5, 7 }
   0x5   :  { %v20_v7 = vsub.s32 0, %v19_v6  ;;  %v34_v9 = vsub.s32 1, %v19_v6  ;;  %v44_v10 = vsub.s32 2, %v19_v6  ;;  %v87_v26 = vsub.s32 3, %v19_v6 }
   0x6   :  { %170 = vset.pattern.permute.xlu0 %v181_v3  ;;  %172 = vset.pattern.permute.xlu1 %v182_v4  ;;  %v101_v27 = vsub.s32 4, %v19_v6  ;;  %v92_v30 = vsub.s32 6, %v19_v6  ;;  %v111_v32 = vsub.s32 5, %v19_v6 }
   0x7   :  { %24 = vperm.xlu0 %170, %v12_v1   ;;  %39 = vperm.xlu1 %172, %v12_v1   ;;  %v21_v12 = vrot.slane %v11_v8, %v20_v7  ;;  %v35_v14 = vrot.slane %v11_v8, %v34_v9  ;;  %v45_v15 = vrot.slane %v11_v8, %v44_v10 }
   0x8   :  { %v88_v29 = vrot.slane %v12_v1, %v87_v26  ;;  %v102_v31 = vrot.slane %v12_v1, %v101_v27  ;;  %v93_v33 = vrot.slane %v12_v1, %v92_v30  ;;  %v112_v37 = vrot.slane %v12_v1, %v111_v32 }
   0xb   :  { %173 = vset.pattern.permute.xlu0 %v179_v0 }
  0x81   :  { %v16_v11 = vpop.permute.xlu0 %15  ;;  %v30_v13 = vpop.permute.xlu1 %29 }
  0x82   :  { %v22_v16 = vmul.f32 %v21_v12, %v16_v11  ;;  %v36_v19 = vmul.f32 %v35_v14, %v30_v13 }
  0x86   :  { %v25_v17 = vpop.permute.xlu0 %24  ;;  %v40_v18 = vpop.permute.xlu1 %39 }
  0x87   :  { %v27_v20 = vadd.f32 %v25_v17, %v22_v16  ;;  %v46_v21 = vmul.f32 %v45_v15, %v40_v18 }
  0x89   :  { %v37_v22 = vadd.f32 %v36_v19, %v27_v20 }
  0x8b   :  { %v47_v23 = vadd.f32 %v46_v21, %v37_v22 }
  0x8d   :  { %48 = vxpose.xlu1.b32.start.end [1/1] (short) (narrow) %v47_v23, 8 }
  0xab   :  { %178 = vset.pattern.permute.xlu1 %v179_v0 }
 0x10d   :  { %v64_v24 = vpop.trf.xlu1 }
 0x10e   :  { %82 = vperm.xlu0 %173, %v64_v24   ;;  %v115_v25 = vmax.f32 %v64_v24, 0.0 }
 0x110   :  { %118 = vperm.xlu1 %178, %v115_v25  }
 0x112   :  { %174 = vset.pattern.permute.xlu0 %v180_v2 }
 0x113   :  { %96 = vperm.xlu0 %174, %v64_v24  }
 0x117   :  { %175 = vset.pattern.permute.xlu0 %v182_v4 }
 0x118   :  { %106 = vperm.xlu0 %175, %v64_v24  }
 0x11c   :  { %176 = vset.pattern.permute.xlu0 %v180_v2 }
 0x11d   :  { %127 = vperm.xlu0 %176, %v115_v25  }
 0x121   :  { %177 = vset.pattern.permute.xlu0 %v182_v4 }
 0x122   :  { %136 = vperm.xlu0 %177, %v115_v25  }
 0x18d   :  { %v83_v28 = vpop.permute.xlu0 %82 }
 0x18e   :  { %v89_v34 = vmul.f32 %v88_v29, %v83_v28 }
 0x18f   :  { %v119_v51 = vpop.permute.xlu1 %118 }
 0x190   :  { %v94_v38 = vadd.f32 %v93_v33, %v89_v34 }
 0x192   :  { %v97_v35 = vpop.permute.xlu0 %96 }
 0x193   :  { %v103_v36 = vmul.f32 %v102_v31, %v97_v35 }
 0x195   :  { %v104_v40 = vadd.f32 %v103_v36, %v94_v38 }
 0x197   :  { %v107_v39 = vpop.permute.xlu0 %106 }
 0x198   :  { %v113_v41 = vmul.f32 %v112_v37, %v107_v39 }
 0x19a   :  { %v114_v42 = vadd.f32 %v113_v41, %v104_v40 }
 0x19c   :  { %v133_v43 = vrot.slane %v114_v42, %v34_v9  ;;  %v128_v44 = vpop.permute.xlu0 %127  ;;  %v142_v46 = vrot.slane %v114_v42, %v44_v10  ;;  %v124_v49 = vrot.slane %v114_v42, %v20_v7 }
 0x19e   :  { %v134_v45 = vadd.f32 %v133_v43, %v128_v44  ;;  %v125_v52 = vadd.f32 %v124_v49, %v119_v51 }
 0x1a0   :  { %145 = vrot.lane.b32.xlu0 %v134_v45, %s183_s0 }
 0x1a1   :  { %v137_v47 = vpop.permute.xlu0 %136 }
 0x1a2   :  { %v143_v48 = vadd.f32 %v142_v46, %v137_v47 }
 0x1a4   :  { %149 = vrot.lane.b32.xlu0 %v143_v48, %s184_s1 }
 0x212   :  { %v146_v50 = vpop.permute.xlu0 %145 }
 0x213   :  { %v153_v53 = vsel %vm152_vm0, %v125_v52, %v146_v50 }
 0x216   :  { %v150_v54 = vpop.permute.xlu0 %149 }
 0x217   :  { %v155_v55 = vsel %vm154_vm1, %v153_v53, %v150_v54 }
 0x218   :  { %157 = vst.msk [vmem:[%s211_s2] sm:$0x7] %vm156_vm2, %v155_v55 }

</bundles_post_ra>
